<compile_context>
chip_gen: v7x
topology: tpu7x:2x2x1
jax: 0.10.0
libtpu: 0.0.40
codegen_flags: <defaults>
</compile_context>

<pallas_src>
import functools

import jax
import jax.numpy as jnp
from jax.experimental import pallas as pl
from jax.experimental.pallas import tpu as pltpu

_LANE = 128
_SUBLANE = 8
_MAX_BT = 128          # batch rows per grid block (per-TC tile along M)
_NEG_PAD = -1e30       # bias for padded output classes -> exp underflows to 0


def _round_up(n, m):
    return ((n + m - 1) // m) * m


# ----------------------------------------------------------------------------
# Kernel: one LSTM step + ReLU + fc + log_softmax per grid step.
# Grid = (batch_block b, time t).  Weights are VMEM resident (constant block
# index); h/c are carried in VMEM scratch between time steps.
# ----------------------------------------------------------------------------
def _streaming_sight_kernel(x_ref, h0_ref, c0_ref, w_x_ref, w_h_ref, b_g_ref,
                            w_fcT_ref, b_fc_ref,
                            logp_ref, h_out_ref, c_out_ref,
                            h_sc, c_sc, *, hp):
    t = pl.program_id(1)

    @pl.when(t == 0)
    def _():
        h_sc[...] = h0_ref[...]
        c_sc[...] = c0_ref[...]

    x = x_ref[0]            # (bt, Dp)
    h = h_sc[...]           # (bt, Hp)
    c = c_sc[...]

    # gates = x @ W_ih^T + h @ W_hh^T + (b_ih + b_hh); f32 MXU accumulation.
    gates = (jnp.dot(x, w_x_ref[...], preferred_element_type=jnp.float32)
             + jnp.dot(h, w_h_ref[...], preferred_element_type=jnp.float32)
             + b_g_ref[...])

    # PyTorch gate order: input, forget, cell(g), output.  Each gate occupies a
    # 128-aligned Hp-wide block so the slices are lane-aligned.  Padded H lanes
    # have zero preactivation and zero initial state -> they stay exactly 0.
    i_g = jax.nn.sigmoid(gates[:, 0 * hp:1 * hp])
    f_g = jax.nn.sigmoid(gates[:, 1 * hp:2 * hp])
    g_g = jnp.tanh(gates[:, 2 * hp:3 * hp])
    o_g = jax.nn.sigmoid(gates[:, 3 * hp:4 * hp])

    c_new = f_g * c + i_g * g_g
    h_new = o_g * jnp.tanh(c_new)
    h_sc[...] = h_new
    c_sc[...] = c_new

    # Flatten (T=1 per step) -> ReLU -> fc -> log_softmax; lane-dense output.
    r = jnp.maximum(h_new, 0.0)
    logits = (jnp.dot(r, w_fcT_ref[...], preferred_element_type=jnp.float32)
              + b_fc_ref[...])
    m = jnp.max(logits, axis=-1, keepdims=True)
    shifted = logits - m
    lse = jnp.log(jnp.sum(jnp.exp(shifted), axis=-1, keepdims=True))
    logp_ref[0] = shifted - lse

    @pl.when(t == pl.num_programs(1) - 1)
    def _():
        h_out_ref[...] = h_new
        c_out_ref[...] = c_new


# ----------------------------------------------------------------------------
# One-time parameter preparation (hoisted off the streaming step path).
# ----------------------------------------------------------------------------
def prepare_params(raw, input_dim, hidden_size, output_dim):
    D, H, O = input_dim, hidden_size, output_dim
    Dp = _round_up(D, _SUBLANE)      # contraction dim for x-dot: sublane pad only
    Hp = _round_up(H, _LANE)         # gate width / fc contraction: lane aligned
    Op = _round_up(O, _LANE)         # output classes: lane-dense stores

    def pad_gate_cols(wT, rows, rows_p):
        # (rows, 4H) -> (rows_p, 4*Hp) with per-gate column padding (zeros).
        w = wT.reshape(rows, 4, H)
        w = jnp.pad(w, ((0, rows_p - rows), (0, 0), (0, Hp - H)))
        return w.reshape(rows_p, 4 * Hp)

    w_x = pad_gate_cols(raw["w_ih"].T.astype(jnp.float32), D, Dp)   # (Dp, 4Hp)
    w_h = pad_gate_cols(raw["w_hh"].T.astype(jnp.float32), H, Hp)   # (Hp, 4Hp)

    b = (raw["b_ih"] + raw["b_hh"]).astype(jnp.float32).reshape(4, H)
    b_gates = jnp.pad(b, ((0, 0), (0, Hp - H))).reshape(1, 4 * Hp)

    w_fcT = jnp.pad(raw["w_fc"].T.astype(jnp.float32),
                    ((0, Hp - H), (0, Op - O)))                     # (Hp, Op)
    b_fc = jnp.pad(raw["b_fc"].astype(jnp.float32), (0, Op - O),
                   constant_values=_NEG_PAD).reshape(1, Op)

    return {
        "w_x": w_x, "w_h": w_h, "b_gates": b_gates, "w_fcT": w_fcT, "b_fc": b_fc,
        "input_dim": D, "hidden_size": H, "output_dim": O,
        "Dp": Dp, "Hp": Hp, "Op": Op,
    }


# ----------------------------------------------------------------------------
# Core: T streaming steps in a single pallas_call (weights VMEM resident).
# ----------------------------------------------------------------------------
def _lstm_stream_call(x, hPt, cPt, prep):
    B, T, D = x.shape
    H, O = prep["hidden_size"], prep["output_dim"]
    Dp, Hp, Op = prep["Dp"], prep["Hp"], prep["Op"]
    assert D == prep["input_dim"]

    Bp = _round_up(B, _SUBLANE)
    if Bp > _MAX_BT:
        bt = _MAX_BT
        Bp = _round_up(Bp, bt)
    else:
        bt = Bp
    nb = Bp // bt

    # Per-call layout ops (amortized over all T steps, not per frame).
    x_p = jnp.pad(jnp.transpose(x.astype(jnp.float32), (1, 0, 2)),
                  ((0, 0), (0, Bp - B), (0, Dp - D)))               # (T, Bp, Dp)
    h0 = jnp.pad(hPt.reshape(B, H).astype(jnp.float32),
                 ((0, Bp - B), (0, Hp - H)))                        # (Bp, Hp)
    c0 = jnp.pad(cPt.reshape(B, H).astype(jnp.float32),
                 ((0, Bp - B), (0, Hp - H)))

    w_x, w_h = prep["w_x"], prep["w_h"]
    b_g, w_fcT, b_fc = prep["b_gates"], prep["w_fcT"], prep["b_fc"]

    # VMEM budget: resident weights/state + double-buffered per-step blocks,
    # with 2x headroom, capped well below v7x's 64 MiB per-TC VMEM.
    resident = sum(int(a.size) * a.dtype.itemsize
                   for a in (w_x, w_h, b_g, w_fcT, b_fc, h0, c0))
    per_step = 2 * 4 * (bt * Dp + bt * Op)      # x & logp blocks, 2 buffers each
    state = 4 * 4 * bt * Hp                     # h/c scratch + h/c output blocks
    vmem_limit = int(min(48 << 20,
                         max(16 << 20, 2 * (resident + per_step + state))))

    kernel = functools.partial(_streaming_sight_kernel, hp=Hp)

    grid_spec = pltpu.PrefetchScalarGridSpec(
        num_scalar_prefetch=0,
        grid=(nb, T),                                   # T last: recurrence axis
        in_specs=[
            pl.BlockSpec((1, bt, Dp), lambda b, t: (t, b, 0)),   # x step
            pl.BlockSpec((bt, Hp), lambda b, t: (b, 0)),         # h0
            pl.BlockSpec((bt, Hp), lambda b, t: (b, 0)),         # c0
            pl.BlockSpec((Dp, 4 * Hp), lambda b, t: (0, 0)),     # w_x   (resident)
            pl.BlockSpec((Hp, 4 * Hp), lambda b, t: (0, 0)),     # w_h   (resident)
            pl.BlockSpec((1, 4 * Hp), lambda b, t: (0, 0)),      # b_gates
            pl.BlockSpec((Hp, Op), lambda b, t: (0, 0)),         # w_fcT (resident)
            pl.BlockSpec((1, Op), lambda b, t: (0, 0)),          # b_fc
        ],
        out_specs=[
            pl.BlockSpec((1, bt, Op), lambda b, t: (t, b, 0)),   # per-step logp
            pl.BlockSpec((bt, Hp), lambda b, t: (b, 0)),         # final h
            pl.BlockSpec((bt, Hp), lambda b, t: (b, 0)),         # final c
        ],
        scratch_shapes=[
            pltpu.VMEM((bt, Hp), jnp.float32),                   # h carry
            pltpu.VMEM((bt, Hp), jnp.float32),                   # c carry
        ],
    )

    logp_p, h_p, c_p = pl.pallas_call(
        kernel,
        out_shape=(
            jax.ShapeDtypeStruct((T, Bp, Op), jnp.float32),
            jax.ShapeDtypeStruct((Bp, Hp), jnp.float32),
            jax.ShapeDtypeStruct((Bp, Hp), jnp.float32),
        ),
        grid_spec=grid_spec,
        compiler_params=pltpu.CompilerParams(
            dimension_semantics=("parallel", "arbitrary"),
            vmem_limit_bytes=vmem_limit),
    )(x_p, h0, c0, w_x, w_h, b_g, w_fcT, b_fc)

    logp = jnp.transpose(logp_p[:, :B, :O], (1, 0, 2))            # (B, T, O)
    h = h_p[:B, :H].reshape(1, B, H)
    c = c_p[:B, :H].reshape(1, B, H)
    return logp, (h, c)


# ----------------------------------------------------------------------------
# Public wrappers.
# ----------------------------------------------------------------------------
def streaming_sight_bi(x, hPt, cPt, prep):
    """Exact module forward. x: (B, 1, D); hPt, cPt: (1, B, H)."""
    B, T, D = x.shape
    assert T == 1, "StreamingSightBi.fc is only shape-consistent for seq_len == 1"
    logp, (h, c) = _lstm_stream_call(x, hPt, cPt, prep)
    return logp[:, 0, :], (h, c)


def streaming_sight_bi_stream(x, hPt, cPt, prep):
    """T consecutive module steps (carried state) in one kernel call.

    x: (B, T, D).  Returns per-frame log-probs (B, T, O) and final (h, c).
    T == 1 reproduces the module exactly.
    """
    return _lstm_stream_call(x, hPt, cPt, prep)


# ----------------------------------------------------------------------------
# Pure-JAX reference (f32, highest matmul precision) and parameter init
# matching nn.LSTM / nn.Linear defaults.
# ----------------------------------------------------------------------------
def _reference_stream(x, hPt, cPt, params):
    B, T, D = x.shape
    H = params["w_hh"].shape[1]
    hi = jax.lax.Precision.HIGHEST
    w_ihT = params["w_ih"].T
    w_hhT = params["w_hh"].T
    w_fcT = params["w_fc"].T
    b = params["b_ih"] + params["b_hh"]

    def step(carry, xt):
        h, c = carry
        gates = (jnp.dot(xt, w_ihT, precision=hi)
                 + jnp.dot(h, w_hhT, precision=hi) + b)
        i = jax.nn.sigmoid(gates[:, 0:H])
        f = jax.nn.sigmoid(gates[:, H:2 * H])
        g = jnp.tanh(gates[:, 2 * H:3 * H])
        o = jax.nn.sigmoid(gates[:, 3 * H:4 * H])
        c = f * c + i * g
        h = o * jnp.tanh(c)
        logits = jnp.dot(jnp.maximum(h, 0.0), w_fcT, precision=hi) + params["b_fc"]
        return (h, c), jax.nn.log_softmax(logits, axis=-1)

    (h, c), logps = jax.lax.scan(step,
                                 (hPt.reshape(B, H), cPt.reshape(B, H)),
                                 jnp.transpose(x, (1, 0, 2)))
    return jnp.transpose(logps, (1, 0, 2)), h, c


def init_params(key, input_dim, hidden_size, output_dim):
    ks = jax.random.split(key, 6)
    k_lstm = 1.0 / jnp.sqrt(hidden_size)
    k_fc = 1.0 / jnp.sqrt(hidden_size)
    return {
        "w_ih": jax.random.uniform(ks[0], (4 * hidden_size, input_dim),
                                   jnp.float32, -k_lstm, k_lstm),
        "w_hh": jax.random.uniform(ks[1], (4 * hidden_size, hidden_size),
                                   jnp.float32, -k_lstm, k_lstm),
        "b_ih": jax.random.uniform(ks[2], (4 * hidden_size,),
                                   jnp.float32, -k_lstm, k_lstm),
        "b_hh": jax.random.uniform(ks[3], (4 * hidden_size,),
                                   jnp.float32, -k_lstm, k_lstm),
        "w_fc": jax.random.uniform(ks[4], (output_dim, hidden_size),
                                   jnp.float32, -k_fc, k_fc),
        "b_fc": jax.random.uniform(ks[5], (output_dim,),
                                   jnp.float32, -k_fc, k_fc),
    }


if __name__ == "__main__":
    key = jax.random.PRNGKey(0)
    B, D, H, O = 2, 8, 32, 16
    T_stream = 8

    k_x1, k_xs, k_h, k_c, k_p = jax.random.split(key, 5)
    hPt = jax.random.normal(k_h, (1, B, H), jnp.float32)
    cPt = jax.random.normal(k_c, (1, B, H), jnp.float32)

    raw = init_params(k_p, D, H, O)
    prep = prepare_params(raw, D, H, O)     # one-time, off the step path

    # --- module-exact single streaming step (T == 1) --------------------------
    x1 = jax.random.normal(k_x1, (B, 1, D), jnp.float32)
    logp1, (h1, c1) = streaming_sight_bi(x1, hPt, cPt, prep)
    jax.block_until_ready((logp1, h1, c1))
    assert logp1.shape == (B, O)
    assert h1.shape == (1, B, H) and c1.shape == (1, B, H)
    assert jnp.allclose(jnp.sum(jnp.exp(logp1), axis=-1), 1.0, atol=1e-5)

    lr, hr, cr = _reference_stream(x1, hPt, cPt, raw)
    assert jnp.max(jnp.abs(logp1 - lr[:, 0, :])) < 5e-2
    assert jnp.max(jnp.abs(h1.reshape(B, H) - hr)) < 5e-2
    assert jnp.max(jnp.abs(c1.reshape(B, H) - cr)) < 5e-2

    # --- T streaming steps inside one pallas_call (weights resident) ----------
    xs = jax.random.normal(k_xs, (B, T_stream, D), jnp.float32)
    logps, (hT, cT) = streaming_sight_bi_stream(xs, hPt, cPt, prep)
    jax.block_until_ready((logps, hT, cT))
    assert logps.shape == (B, T_stream, O)

    lr, hr, cr = _reference_stream(xs, hPt, cPt, raw)
    assert jnp.allclose(jnp.sum(jnp.exp(logps), axis=-1), 1.0, atol=1e-5)
    assert jnp.max(jnp.abs(logps - lr)) < 5e-2
    assert jnp.max(jnp.abs(hT.reshape(B, H) - hr)) < 5e-2
    assert jnp.max(jnp.abs(cT.reshape(B, H) - cr)) < 5e-2

    print("KERNEL_OK")
</pallas_src>

<mosaic_0001>
module attributes {stable_mosaic.version = 11 : i64} {
  func.func @_streaming_sight_kernel(%arg0: i32, %arg1: i32, %arg2: memref<1x8x8xf32, #tpu.memory_space<vmem>>, %arg3: memref<8x128xf32, #tpu.memory_space<vmem>>, %arg4: memref<8x128xf32, #tpu.memory_space<vmem>>, %arg5: memref<8x512xf32, #tpu.memory_space<vmem>>, %arg6: memref<128x512xf32, #tpu.memory_space<vmem>>, %arg7: memref<1x512xf32, #tpu.memory_space<vmem>>, %arg8: memref<128x128xf32, #tpu.memory_space<vmem>>, %arg9: memref<1x128xf32, #tpu.memory_space<vmem>>, %arg10: memref<1x8x128xf32, #tpu.memory_space<vmem>>, %arg11: memref<8x128xf32, #tpu.memory_space<vmem>>, %arg12: memref<8x128xf32, #tpu.memory_space<vmem>>, %arg13: memref<8x128xf32, #tpu.memory_space<vmem>>, %arg14: memref<8x128xf32, #tpu.memory_space<vmem>>) attributes {dimension_semantics = [#tpu.dimension_semantics<parallel>, #tpu.dimension_semantics<arbitrary>], iteration_bounds = array<i64: 1, 1>, scalar_prefetch = 0 : i64, scratch_operands = 2 : i64, tpu.core_type = #tpu.core_type<tc>, window_params = [{transform_indices = @transform_0, window_bounds = array<i64: 1, 8, 8>}, {transform_indices = @transform_1, window_bounds = array<i64: 8, 128>}, {transform_indices = @transform_2, window_bounds = array<i64: 8, 128>}, {pipeline_mode = #tpu.pipeline_mode<synchronous>, transform_indices = @transform_3, window_bounds = array<i64: 8, 512>}, {pipeline_mode = #tpu.pipeline_mode<synchronous>, transform_indices = @transform_4, window_bounds = array<i64: 128, 512>}, {pipeline_mode = #tpu.pipeline_mode<synchronous>, transform_indices = @transform_5, window_bounds = array<i64: 1, 512>}, {pipeline_mode = #tpu.pipeline_mode<synchronous>, transform_indices = @transform_6, window_bounds = array<i64: 128, 128>}, {pipeline_mode = #tpu.pipeline_mode<synchronous>, transform_indices = @transform_7, window_bounds = array<i64: 1, 128>}, {transform_indices = @transform_8, window_bounds = array<i64: 1, 8, 128>}, {transform_indices = @transform_9, window_bounds = array<i64: 8, 128>}, {transform_indices = @transform_10, window_bounds = array<i64: 8, 128>}]} {
    %c0_i32 = arith.constant 0 : i32
    %0 = arith.cmpi eq, %arg1, %c0_i32 : i32
    %1 = arith.extui %0 : i1 to i32
    %c0_i32_0 = arith.constant 0 : i32
    %2 = arith.cmpi ne, %1, %c0_i32_0 : i32
    scf.if %2 {
      %c0_34 = arith.constant 0 : index
      %c0_35 = arith.constant 0 : index
      %65 = vector.load %arg3[%c0_34, %c0_35] : memref<8x128xf32, #tpu.memory_space<vmem>>, vector<8x128xf32>
      %c0_36 = arith.constant 0 : index
      %c0_37 = arith.constant 0 : index
      %66 = vector.load %arg13[%c0_36, %c0_37] : memref<8x128xf32, #tpu.memory_space<vmem>>, vector<8x128xf32>
      tpu.vector_store %arg13[%c0_36, %c0_37], %65 {strides = array<i32>} : memref<8x128xf32, #tpu.memory_space<vmem>>, vector<8x128xf32>,
      %c0_38 = arith.constant 0 : index
      %c0_39 = arith.constant 0 : index
      %67 = vector.load %arg4[%c0_38, %c0_39] : memref<8x128xf32, #tpu.memory_space<vmem>>, vector<8x128xf32>
      %c0_40 = arith.constant 0 : index
      %c0_41 = arith.constant 0 : index
      %68 = vector.load %arg14[%c0_40, %c0_41] : memref<8x128xf32, #tpu.memory_space<vmem>>, vector<8x128xf32>
      tpu.vector_store %arg14[%c0_40, %c0_41], %67 {strides = array<i32>} : memref<8x128xf32, #tpu.memory_space<vmem>>, vector<8x128xf32>,
    } else {
    }
    %c0 = arith.constant 0 : index
    %c0_1 = arith.constant 0 : index
    %c0_2 = arith.constant 0 : index
    %3 = vector.load %arg2[%c0, %c0_1, %c0_2] : memref<1x8x8xf32, #tpu.memory_space<vmem>>, vector<1x8x8xf32>
    %4 = vector.shape_cast %3 : vector<1x8x8xf32> to vector<8x8xf32>
    %c0_3 = arith.constant 0 : index
    %c0_4 = arith.constant 0 : index
    %5 = vector.load %arg13[%c0_3, %c0_4] : memref<8x128xf32, #tpu.memory_space<vmem>>, vector<8x128xf32>
    %c0_5 = arith.constant 0 : index
    %c0_6 = arith.constant 0 : index
    %6 = vector.load %arg14[%c0_5, %c0_6] : memref<8x128xf32, #tpu.memory_space<vmem>>, vector<8x128xf32>
    %c0_7 = arith.constant 0 : index
    %c0_8 = arith.constant 0 : index
    %7 = vector.load %arg5[%c0_7, %c0_8] : memref<8x512xf32, #tpu.memory_space<vmem>>, vector<8x512xf32>
    %cst = arith.constant dense<0.000000e+00> : vector<8x512xf32>
    %8 = tpu.matmul %4, %7, %cst {dimension_numbers = #tpu.dot_dimension_numbers<[1], [0], [0], [1], [0, 0, 1, 1], [], []>} : vector<8x8xf32>, vector<8x512xf32>, vector<8x512xf32> -> vector<8x512xf32>
    %c0_9 = arith.constant 0 : index
    %c0_10 = arith.constant 0 : index
    %9 = vector.load %arg6[%c0_9, %c0_10] : memref<128x512xf32, #tpu.memory_space<vmem>>, vector<128x512xf32>
    %cst_11 = arith.constant dense<0.000000e+00> : vector<8x512xf32>
    %10 = tpu.matmul %5, %9, %cst_11 {dimension_numbers = #tpu.dot_dimension_numbers<[1], [0], [0], [1], [0, 0, 1, 1], [], []>} : vector<8x128xf32>, vector<128x512xf32>, vector<8x512xf32> -> vector<8x512xf32>
    %11 = arith.addf %8, %10 : vector<8x512xf32>
    %c0_12 = arith.constant 0 : index
    %c0_13 = arith.constant 0 : index
    %12 = vector.load %arg7[%c0_12, %c0_13] : memref<1x512xf32, #tpu.memory_space<vmem>>, vector<1x512xf32>
    %13 = vector.broadcast %12 : vector<1x512xf32> to vector<8x512xf32>
    %14 = arith.addf %11, %13 : vector<8x512xf32>
    %15 = vector.extract_strided_slice %14 {offsets = [0, 0], sizes = [8, 128], strides = [1, 1]} : vector<8x512xf32> to vector<8x128xf32>
    %16 = arith.negf %15 : vector<8x128xf32>
    %17 = math.exp %16 : vector<8x128xf32>
    %cst_14 = arith.constant 1.000000e+00 : f32
    %18 = vector.broadcast %cst_14 : f32 to vector<8x128xf32>
    %19 = arith.addf %18, %17 : vector<8x128xf32>
    %20 = arith.divf %18, %19 : vector<8x128xf32>
    %21 = vector.extract_strided_slice %14 {offsets = [0, 128], sizes = [8, 128], strides = [1, 1]} : vector<8x512xf32> to vector<8x128xf32>
    %22 = arith.negf %21 : vector<8x128xf32>
    %23 = math.exp %22 : vector<8x128xf32>
    %cst_15 = arith.constant 1.000000e+00 : f32
    %24 = vector.broadcast %cst_15 : f32 to vector<8x128xf32>
    %25 = arith.addf %24, %23 : vector<8x128xf32>
    %26 = arith.divf %24, %25 : vector<8x128xf32>
    %27 = vector.extract_strided_slice %14 {offsets = [0, 256], sizes = [8, 128], strides = [1, 1]} : vector<8x512xf32> to vector<8x128xf32>
    %28 = math.tanh %27 : vector<8x128xf32>
    %29 = vector.extract_strided_slice %14 {offsets = [0, 384], sizes = [8, 128], strides = [1, 1]} : vector<8x512xf32> to vector<8x128xf32>
    %30 = arith.negf %29 : vector<8x128xf32>
    %31 = math.exp %30 : vector<8x128xf32>
    %cst_16 = arith.constant 1.000000e+00 : f32
    %32 = vector.broadcast %cst_16 : f32 to vector<8x128xf32>
    %33 = arith.addf %32, %31 : vector<8x128xf32>
    %34 = arith.divf %32, %33 : vector<8x128xf32>
    %35 = arith.mulf %26, %6 : vector<8x128xf32>
    %36 = arith.mulf %20, %28 : vector<8x128xf32>
    %37 = arith.addf %35, %36 : vector<8x128xf32>
    %38 = math.tanh %37 : vector<8x128xf32>
    %39 = arith.mulf %34, %38 : vector<8x128xf32>
    %c0_17 = arith.constant 0 : index
    %c0_18 = arith.constant 0 : index
    %40 = vector.load %arg13[%c0_17, %c0_18] : memref<8x128xf32, #tpu.memory_space<vmem>>, vector<8x128xf32>
    tpu.vector_store %arg13[%c0_17, %c0_18], %39 {strides = array<i32>} : memref<8x128xf32, #tpu.memory_space<vmem>>, vector<8x128xf32>,
    %c0_19 = arith.constant 0 : index
    %c0_20 = arith.constant 0 : index
    %41 = vector.load %arg14[%c0_19, %c0_20] : memref<8x128xf32, #tpu.memory_space<vmem>>, vector<8x128xf32>
    tpu.vector_store %arg14[%c0_19, %c0_20], %37 {strides = array<i32>} : memref<8x128xf32, #tpu.memory_space<vmem>>, vector<8x128xf32>,
    %cst_21 = arith.constant 0.000000e+00 : f32
    %42 = vector.broadcast %cst_21 : f32 to vector<8x128xf32>
    %43 = arith.maximumf %39, %42 : vector<8x128xf32>
    %c0_22 = arith.constant 0 : index
    %c0_23 = arith.constant 0 : index
    %44 = vector.load %arg8[%c0_22, %c0_23] : memref<128x128xf32, #tpu.memory_space<vmem>>, vector<128x128xf32>
    %cst_24 = arith.constant dense<0.000000e+00> : vector<8x128xf32>
    %45 = tpu.matmul %43, %44, %cst_24 {dimension_numbers = #tpu.dot_dimension_numbers<[1], [0], [0], [1], [0, 0, 1, 1], [], []>} : vector<8x128xf32>, vector<128x128xf32>, vector<8x128xf32> -> vector<8x128xf32>
    %c0_25 = arith.constant 0 : index
    %c0_26 = arith.constant 0 : index
    %46 = vector.load %arg9[%c0_25, %c0_26] : memref<1x128xf32, #tpu.memory_space<vmem>>, vector<1x128xf32>
    %47 = vector.broadcast %46 : vector<1x128xf32> to vector<8x128xf32>
    %48 = arith.addf %45, %47 : vector<8x128xf32>
    %cst_27 = arith.constant dense<0xFF800000> : vector<8xf32>
    %49 = vector.multi_reduction <maximumf>, %48, %cst_27 [1] : vector<8x128xf32> to vector<8xf32>
    %50 = vector.shape_cast %49 : vector<8xf32> to vector<8x1xf32>
    %51 = vector.broadcast %50 : vector<8x1xf32> to vector<8x128xf32>
    %52 = arith.subf %48, %51 : vector<8x128xf32>
    %53 = math.exp %52 : vector<8x128xf32>
    %cst_28 = arith.constant dense<0.000000e+00> : vector<8xf32>
    %54 = vector.multi_reduction <add>, %53, %cst_28 [1] : vector<8x128xf32> to vector<8xf32>
    %55 = vector.shape_cast %54 : vector<8xf32> to vector<8x1xf32>
    %56 = math.log %55 : vector<8x1xf32>
    %57 = vector.broadcast %56 : vector<8x1xf32> to vector<8x128xf32>
    %58 = arith.subf %52, %57 : vector<8x128xf32>
    %c0_29 = arith.constant 0 : index
    %c0_30 = arith.constant 0 : index
    %c0_31 = arith.constant 0 : index
    %59 = vector.load %arg10[%c0_29, %c0_30, %c0_31] : memref<1x8x128xf32, #tpu.memory_space<vmem>>, vector<1x8x128xf32>
    %60 = vector.shape_cast %59 : vector<1x8x128xf32> to vector<8x128xf32>
    %61 = vector.shape_cast %58 : vector<8x128xf32> to vector<1x8x128xf32>
    tpu.vector_store %arg10[%c0_29, %c0_30, %c0_31], %61 {strides = array<i32>} : memref<1x8x128xf32, #tpu.memory_space<vmem>>, vector<1x8x128xf32>,
    %c0_i32_32 = arith.constant 0 : i32
    %62 = arith.cmpi eq, %arg1, %c0_i32_32 : i32
    %63 = arith.extui %62 : i1 to i32
    %c0_i32_33 = arith.constant 0 : i32
    %64 = arith.cmpi ne, %63, %c0_i32_33 : i32
    scf.if %64 {
      %c0_34 = arith.constant 0 : index
      %c0_35 = arith.constant 0 : index
      %65 = vector.load %arg11[%c0_34, %c0_35] : memref<8x128xf32, #tpu.memory_space<vmem>>, vector<8x128xf32>
      tpu.vector_store %arg11[%c0_34, %c0_35], %39 {strides = array<i32>} : memref<8x128xf32, #tpu.memory_space<vmem>>, vector<8x128xf32>,
      %c0_36 = arith.constant 0 : index
      %c0_37 = arith.constant 0 : index
      %66 = vector.load %arg12[%c0_36, %c0_37] : memref<8x128xf32, #tpu.memory_space<vmem>>, vector<8x128xf32>
      tpu.vector_store %arg12[%c0_36, %c0_37], %37 {strides = array<i32>} : memref<8x128xf32, #tpu.memory_space<vmem>>, vector<8x128xf32>,
    } else {
    }
    return
  }
  func.func @transform_0(%arg0: i32, %arg1: i32) -> (i32, i32, i32) {
    %c0_i32 = arith.constant 0 : i32
    %c0_i32_0 = arith.constant 0 : i32
    return %arg1, %arg0, %c0_i32 : i32, i32, i32
  }
  func.func @transform_1(%arg0: i32, %arg1: i32) -> (i32, i32) {
    %c0_i32 = arith.constant 0 : i32
    %c0_i32_0 = arith.constant 0 : i32
    return %arg0, %c0_i32 : i32, i32
  }
  func.func @transform_2(%arg0: i32, %arg1: i32) -> (i32, i32) {
    %c0_i32 = arith.constant 0 : i32
    %c0_i32_0 = arith.constant 0 : i32
    return %arg0, %c0_i32 : i32, i32
  }
  func.func @transform_3(%arg0: i32, %arg1: i32) -> (i32, i32) {
    %c0_i32 = arith.constant 0 : i32
    %c0_i32_0 = arith.constant 0 : i32
    %c0_i32_1 = arith.constant 0 : i32
    return %c0_i32, %c0_i32_0 : i32, i32
  }
  func.func @transform_4(%arg0: i32, %arg1: i32) -> (i32, i32) {
    %c0_i32 = arith.constant 0 : i32
    %c0_i32_0 = arith.constant 0 : i32
    %c0_i32_1 = arith.constant 0 : i32
    return %c0_i32, %c0_i32_0 : i32, i32
  }
  func.func @transform_5(%arg0: i32, %arg1: i32) -> (i32, i32) {
    %c0_i32 = arith.constant 0 : i32
    %c0_i32_0 = arith.constant 0 : i32
    %c0_i32_1 = arith.constant 0 : i32
    return %c0_i32, %c0_i32_0 : i32, i32
  }
  func.func @transform_6(%arg0: i32, %arg1: i32) -> (i32, i32) {
    %c0_i32 = arith.constant 0 : i32
    %c0_i32_0 = arith.constant 0 : i32
    %c0_i32_1 = arith.constant 0 : i32
    return %c0_i32, %c0_i32_0 : i32, i32
  }
  func.func @transform_7(%arg0: i32, %arg1: i32) -> (i32, i32) {
    %c0_i32 = arith.constant 0 : i32
    %c0_i32_0 = arith.constant 0 : i32
    %c0_i32_1 = arith.constant 0 : i32
    return %c0_i32, %c0_i32_0 : i32, i32
  }
  func.func @transform_8(%arg0: i32, %arg1: i32) -> (i32, i32, i32) {
    %c0_i32 = arith.constant 0 : i32
    %c0_i32_0 = arith.constant 0 : i32
    return %arg1, %arg0, %c0_i32 : i32, i32, i32
  }
  func.func @transform_9(%arg0: i32, %arg1: i32) -> (i32, i32) {
    %c0_i32 = arith.constant 0 : i32
    %c0_i32_0 = arith.constant 0 : i32
    return %arg0, %c0_i32 : i32, i32
  }
  func.func @transform_10(%arg0: i32, %arg1: i32) -> (i32, i32) {
    %c0_i32 = arith.constant 0 : i32
    %c0_i32_0 = arith.constant 0 : i32
    return %arg0, %c0_i32 : i32, i32
  }
}

</mosaic_0001>

<bundles_post_ra>
// kernel: tpu_custom_call.1
= control target key start
LH: loop header
LB: loop body
LE: loop exit
PB: predicated region body
PF: predicated region fallthrough
CT: control target
= control target key end

     0   :  { %16 = vsyncpa [#allocation5], 0  ;;  %s1268_s0 = inlined_call_operand.hbm [shape: f32[1,8,8], index: 0, kind: input, shape index: {}]   ;;  %s1269_s1 = inlined_call_operand.hbm [shape: f32[8,128], index: 1, kind: input, shape index: {}]   ;;  %s1270_s2 = inlined_call_operand.hbm [shape: f32[8,128], index: 2, kind: input, shape index: {}]   ;;  %s1271_s3 = inlined_call_operand.hbm [shape: f32[8,512], index: 3, kind: input, shape index: {}]   ;;  %s1272_s4 = inlined_call_operand.hbm [shape: f32[128,512], index: 4, kind: input, shape index: {}]   ;;  %s1273_s5 = inlined_call_operand.vmem [shape: f32[1,512], index: 5, kind: input, shape index: {}]   ;;  %s1274_s6 = inlined_call_operand.hbm [shape: f32[128,128], index: 6, kind: input, shape index: {}]   ;;  %s1275_s7 = inlined_call_operand.vmem [shape: f32[1,128], index: 7, kind: input, shape index: {}]   ;;  %s1276_s8 = inlined_call_operand.hbm [shape: f32[1,8,128], index: 8, kind: output, shape index: {0}]   ;;  %s1277_s9 = inlined_call_operand.hbm [shape: f32[8,128], index: 9, kind: output, shape index: {1}]   ;;  %s1278_s10 = inlined_call_operand.hbm [shape: f32[8,128], index: 10, kind: output, shape index: {2}]  }
   0x1   :  { %17 = vsyncpa [#allocation8], 0 }
   0x2   :  { %18 = vsyncpa [#allocation11], 0 }
   0x3   :  { %19 = vsyncpa [#allocation14], 0 }
   0x4   :  { %20 = vsyncpa [#allocation6], 0 }
   0x5   :  { %21 = vsyncpa [#allocation17], 0  ;;  %s1078_s13 = smov [#allocation7]   ;;  %s1079_s15 = smov [#allocation10]  }
   0x6   :  { %s38_s14 = sshll.u32 %s1078_s13, 4  ;;  %s58_s16 = sshll.u32 %s1079_s15, 4  ;;  %s39_s14 = int_to_ptr.vmem [resolvable:$true] %s38_s14  ;;  %s59_s16 = int_to_ptr.vmem [resolvable:$true] %s58_s16 }
   0x7   :  { %s868_s19 = scalar_lea.hbm %s1269_s1, 128 }
   0x8   :  { %p869_p0 = scmp.ne.s32.totalorder %s1269_s1, %s868_s19  ;;  %p872_p1 = scmp.lt.u32.totalorder %s868_s19, %s1269_s1 }
   0xa   :  { %p874_p2 = pnand %p872_p1, %p869_p0 }
   0xc   :  { %877 = shalt.err (!%p874_p2)
}
   0xd   :  { %s878_s24 = scalar_lea.vmem %s39_s14, 128  ;;  %p883_p4 = scmp.lt.s32.totalorder %s39_s14, %s39_s14 }
   0xe   :  { %p879_p3 = scmp.ne.s32.totalorder %s39_s14, %s878_s24  ;;  %p884_p5 = scmp.lt.s32.totalorder %s878_s24, %s878_s24 }
  0x10   :  { %p885_p6 = por %p884_p5, %p883_p4 }
  0x12   :  { %p886_p7 = pnand %p885_p6, %p879_p3 }
  0x14   :  { %889 = shalt.err (!%p886_p7)
}
  0x15   :  { %41 = dma.hbm_to_vmem [thread:$0]  %s1269_s1, 128, %s39_s14, [#allocation8]  }
  0x16   :  { %s890_s29 = scalar_lea.hbm %s1271_s3, 512 }
  0x17   :  { %p891_p8 = scmp.ne.s32.totalorder %s1271_s3, %s890_s29  ;;  %p894_p9 = scmp.lt.u32.totalorder %s890_s29, %s1271_s3 }
  0x19   :  { %p896_p10 = pnand %p894_p9, %p891_p8 }
  0x1b   :  { %899 = shalt.err (!%p896_p10)
}
  0x1c   :  { %s900_s15 = scalar_lea.vmem %s59_s16, 512  ;;  %p905_p12 = scmp.lt.s32.totalorder %s59_s16, %s59_s16 }
  0x1d   :  { %p901_p11 = scmp.ne.s32.totalorder %s59_s16, %s900_s15  ;;  %p906_p13 = scmp.lt.s32.totalorder %s900_s15, %s900_s15 }
  0x1f   :  { %p907_p0 = por %p906_p13, %p905_p12 }
  0x21   :  { %p908_p1 = pnand %p907_p0, %p901_p11 }
  0x23   :  { %911 = shalt.err (!%p908_p1)
}
  0x24   :  { %61 = dma.hbm_to_vmem [thread:$0]  %s1271_s3, 512, %s59_s16, [#allocation11]  }
  0x25   :  { %s1080_s17 = smov [#allocation4]   ;;  %s1081_s19 = smov [#allocation9]  }
  0x26   :  { %s28_s18 = sshll.u32 %s1080_s17, 4  ;;  %s48_s20 = sshll.u32 %s1081_s19, 4  ;;  %s29_s18 = int_to_ptr.vmem [resolvable:$true] %s28_s18  ;;  %s49_s20 = int_to_ptr.vmem [resolvable:$true] %s48_s20 }
  0x27   :  { %s912_s23 = scalar_lea.hbm %s1268_s0, 128 }
  0x28   :  { %p913_p2 = scmp.ne.s32.totalorder %s1268_s0, %s912_s23  ;;  %p916_p3 = scmp.lt.u32.totalorder %s912_s23, %s1268_s0 }
  0x2a   :  { %p918_p4 = pnand %p916_p3, %p913_p2 }
  0x2c   :  { %921 = shalt.err (!%p918_p4)
}
  0x2d   :  { %s922_s3 = scalar_lea.vmem %s29_s18, 128  ;;  %p927_p6 = scmp.lt.s32.totalorder %s29_s18, %s29_s18 }
  0x2e   :  { %p923_p5 = scmp.ne.s32.totalorder %s29_s18, %s922_s3  ;;  %p928_p7 = scmp.lt.s32.totalorder %s922_s3, %s922_s3 }
  0x30   :  { %p929_p8 = por %p928_p7, %p927_p6 }
  0x32   :  { %p930_p9 = pnand %p929_p8, %p923_p5 }
  0x34   :  { %933 = shalt.err (!%p930_p9)
}
  0x35   :  { %31 = dma.hbm_to_vmem [thread:$0]  %s1268_s0, 128, %s29_s18, [#allocation5]  }
  0x36   :  { %s934_s11 = scalar_lea.hbm %s1270_s2, 128 }
  0x37   :  { %p935_p10 = scmp.ne.s32.totalorder %s1270_s2, %s934_s11  ;;  %p938_p11 = scmp.lt.u32.totalorder %s934_s11, %s1270_s2 }
  0x39   :  { %p940_p12 = pnand %p938_p11, %p935_p10 }
  0x3b   :  { %943 = shalt.err (!%p940_p12)
}
  0x3c   :  { %s944_s14 = scalar_lea.vmem %s49_s20, 128  ;;  %p949_p0 = scmp.lt.s32.totalorder %s49_s20, %s49_s20 }
  0x3d   :  { %p945_p13 = scmp.ne.s32.totalorder %s49_s20, %s944_s14  ;;  %p950_p1 = scmp.lt.s32.totalorder %s944_s14, %s944_s14 }
  0x3f   :  { %p951_p2 = por %p950_p1, %p949_p0 }
  0x41   :  { %p952_p3 = pnand %p951_p2, %p945_p13 }
  0x43   :  { %955 = shalt.err (!%p952_p3)
}
  0x44   :  { %51 = dma.hbm_to_vmem [thread:$0]  %s1270_s2, 128, %s49_s20, [#allocation8]  }
  0x45   :  { %s1082_s18 = smov [#allocation12]   ;;  %s956_s23 = scalar_lea.hbm %s1272_s4, 8192 }
  0x46   :  { %s67_s19 = sshll.u32 %s1082_s18, 4  ;;  %p957_p4 = scmp.ne.s32.totalorder %s1272_s4, %s956_s23  ;;  %s68_s19 = int_to_ptr.vmem [resolvable:$true] %s67_s19 }
  0x47   :  { %p960_p5 = scmp.lt.u32.totalorder %s956_s23, %s1272_s4 }
  0x49   :  { %p962_p6 = pnand %p960_p5, %p957_p4 }
  0x4b   :  { %965 = shalt.err (!%p962_p6)
}
  0x4c   :  { %s966_s3 = scalar_lea.vmem %s68_s19, 8192  ;;  %p971_p8 = scmp.lt.s32.totalorder %s68_s19, %s68_s19 }
  0x4d   :  { %p967_p7 = scmp.ne.s32.totalorder %s68_s19, %s966_s3  ;;  %p972_p9 = scmp.lt.s32.totalorder %s966_s3, %s966_s3 }
  0x4f   :  { %p973_p10 = por %p972_p9, %p971_p8 }
  0x51   :  { %p974_p11 = pnand %p973_p10, %p967_p7 }
  0x53   :  { %977 = shalt.err (!%p974_p11)
}
  0x54   :  { %s1083_s2 = smov 512   ;;  %s1084_s20 = smov 32  }
  0x55   :  { %73 = dma.hbm_to_vmem [thread:$0]  %s1272_s4, 8192, %s68_s19, [#allocation11], %s1083_s2, %s1083_s2, %s1084_s20  }
  0x56   :  { %s1085_s29 = smov [#allocation13]   ;;  %s978_s13 = scalar_lea.hbm %s1274_s6, 2048 }
  0x57   :  { %s81_s30 = sshll.u32 %s1085_s29, 4  ;;  %p979_p12 = scmp.ne.s32.totalorder %s1274_s6, %s978_s13  ;;  %s82_s30 = int_to_ptr.vmem [resolvable:$true] %s81_s30 }
  0x58   :  { %p982_p13 = scmp.lt.u32.totalorder %s978_s13, %s1274_s6 }
  0x5a   :  { %p984_p0 = pnand %p982_p13, %p979_p12 }
  0x5c   :  { %987 = shalt.err (!%p984_p0)
}
  0x5d   :  { %s988_s17 = scalar_lea.vmem %s82_s30, 2048  ;;  %p993_p2 = scmp.lt.s32.totalorder %s82_s30, %s82_s30 }
  0x5e   :  { %p989_p1 = scmp.ne.s32.totalorder %s82_s30, %s988_s17  ;;  %p994_p3 = scmp.lt.s32.totalorder %s988_s17, %s988_s17 }
  0x60   :  { %p995_p4 = por %p994_p3, %p993_p2 }
  0x62   :  { %p996_p5 = pnand %p995_p4, %p989_p1 }
  0x64   :  { %999 = shalt.err (!%p996_p5)
}
  0x65   :  { %s1086_s4 = smov 128   ;;  %s1087_s18 = smov 8  }
  0x66   :  { %87 = dma.hbm_to_vmem [thread:$0]  %s1274_s6, 2048, %s82_s30, [#allocation14], %s1086_s4, %s1086_s4, %s1087_s18  }
  0x67   :  { %1066 = dma.done.wait [#allocation5], 128  }
  0x68   :  { %1067 = vsyncadd [#allocation5], 4294967168 }
  0x69   :  { %1068 = dma.done.wait [#allocation8], 256  }
  0x6a   :  { %1069 = vsyncadd [#allocation8], 4294967040 }
  0x6b   :  { %1070 = dma.done.wait [#allocation11], 8704  }
  0x6c   :  { %1071 = vsyncadd [#allocation11], 4294958592 }
  0x6d   :  { %1072 = dma.done.wait [#allocation14], 2048  }
  0x6e   :  { %1073 = vsyncadd [#allocation14], 4294965248  ;;  %v1088_v0 = vmov 0.0   ;;  %v126_v1 = vld [vmem:[#allocation12 + $0x18] sm:$0xff]  ;;  %v125_v3 = vld [vmem:[#allocation12 + $0x10] sm:$0xff]  ;;  %vm329_vm0 = vcmask 64512  }
  0x6f   :  { %322 = vmatprep.mubr.f32.mxu1 %v1088_v0  ;;  %251 = vmatprep.mubr.f32.mxu0 %v1088_v0  ;;  %v130_v2 = vld [vmem:[#allocation12 + $0x38] sm:$0xff]  ;;  %v129_v5 = vld [vmem:[#allocation12 + $0x30] sm:$0xff]  ;;  %v124_v6 = vld [vmem:[#allocation12 + $0x8] sm:$0xff]  ;;  %vm1090_vm1 = vmmov 0   ;;  %s1091_s24 = smov [#allocation16]  }
  0x70   :  { %v772_v4 = vpack.c.bf16 %v130_v2, %v126_v1  ;;  %v128_v7 = vld [vmem:[#allocation12 + $0x28] sm:$0xff]  ;;  %v774_v8 = vpack.c.bf16 %v129_v5, %v125_v3  ;;  %v134_v10 = vld [vmem:[#allocation12 + $0x58] sm:$0xff]  ;;  %v123_v12 = vld [vmem:[#allocation12] sm:$0xff]  ;;  %s653_s25 = sshll.u32 %s1091_s24, 4  ;;  %s654_s25 = int_to_ptr.vmem [resolvable:$true] %s653_s25 }
  0x71   :  { %v740_v9 = vpack.c.bf16 %v128_v7, %v124_v6  ;;  %v138_v11 = vld [vmem:[#allocation12 + $0x78] sm:$0xff]  ;;  %v127_v14 = vld [vmem:[#allocation12 + $0x20] sm:$0xff]  ;;  %v133_v15 = vld [vmem:[#allocation12 + $0x50] sm:$0xff]  ;;  %s1000_s26 = scalar_lea.vmem %s654_s25, 128  ;;  %p1005_p7 = scmp.lt.s32.totalorder %s654_s25, %s654_s25 }
  0x72   :  { %773 = vmatprep.subr.bf16.mxu1 %v772_v4  ;;  %v776_v13 = vpack.c.bf16 %v138_v11, %v134_v10  ;;  %v137_v16 = vld [vmem:[#allocation12 + $0x70] sm:$0xff]  ;;  %v742_v17 = vpack.c.bf16 %v127_v14, %v123_v12  ;;  %v132_v19 = vld [vmem:[#allocation12 + $0x48] sm:$0xff]  ;;  %v142_v21 = vld [vmem:[#allocation12 + $0x98] sm:$0xff]  ;;  %p1001_p6 = scmp.ne.s32.totalorder %s654_s25, %s1000_s26  ;;  %p1006_p8 = scmp.lt.s32.totalorder %s1000_s26, %s1000_s26 }
  0x73   :  { %775 = vmatpush1.bf16.msra.mxu1 %v774_v8  ;;  %741 = vmatprep.subr.bf16.mxu0 %v740_v9  ;;  %v778_v18 = vpack.c.bf16 %v137_v16, %v133_v15  ;;  %v136_v20 = vld [vmem:[#allocation12 + $0x68] sm:$0xff]  ;;  %v146_v23 = vld [vmem:[#allocation12 + $0xb8] sm:$0xff]  ;;  %v131_v24 = vld [vmem:[#allocation12 + $0x40] sm:$0xff] }
  0x74   :  { %777 = vmatprep.subr.bf16.mxu1 %v776_v13  ;;  %v744_v22 = vpack.c.bf16 %v136_v20, %v132_v19  ;;  %v135_v25 = vld [vmem:[#allocation12 + $0x60] sm:$0xff]  ;;  %743 = vmatpush1.bf16.msra.mxu0 %v742_v17  ;;  %v780_v26 = vpack.c.bf16 %v146_v23, %v142_v21  ;;  %v141_v28 = vld [vmem:[#allocation12 + $0x90] sm:$0xff]  ;;  %v140_v30 = vld [vmem:[#allocation12 + $0x88] sm:$0xff]  ;;  %p1007_p9 = por %p1006_p8, %p1005_p7 }
  0x75   :  { %v746_v27 = vpack.c.bf16 %v135_v25, %v131_v24  ;;  %v145_v29 = vld [vmem:[#allocation12 + $0xb0] sm:$0xff]  ;;  %v144_v31 = vld [vmem:[#allocation12 + $0xa8] sm:$0xff]  ;;  %v150_v32 = vld [vmem:[#allocation12 + $0xd8] sm:$0xff] }
  0x76   :  { %745 = vmatprep.subr.bf16.mxu0 %v744_v22  ;;  %v154_v33 = vld [vmem:[#allocation12 + $0xf8] sm:$0xff]  ;;  %v782_v34 = vpack.c.bf16 %v145_v29, %v141_v28  ;;  %v748_v35 = vpack.c.bf16 %v144_v31, %v140_v30  ;;  %v139_v36 = vld [vmem:[#allocation12 + $0x80] sm:$0xff]  ;;  %v149_v38 = vld [vmem:[#allocation12 + $0xd0] sm:$0xff]  ;;  %p1008_p10 = pnand %p1007_p9, %p1001_p6 }
  0x77   :  { %779 = vmatpush1.bf16.msra.mxu1 %v778_v18  ;;  %v143_v37 = vld [vmem:[#allocation12 + $0xa0] sm:$0xff]  ;;  %v784_v39 = vpack.c.bf16 %v154_v33, %v150_v32  ;;  %v153_v40 = vld [vmem:[#allocation12 + $0xf0] sm:$0xff]  ;;  %v148_v41 = vld [vmem:[#allocation12 + $0xc8] sm:$0xff] }
  0x78   :  { %781 = vmatprep.subr.bf16.mxu1 %v780_v26  ;;  %v152_v42 = vld [vmem:[#allocation12 + $0xe8] sm:$0xff]  ;;  %747 = vmatpush1.bf16.msra.mxu0 %v746_v27  ;;  %v750_v43 = vpack.c.bf16 %v143_v37, %v139_v36  ;;  %v158_v44 = vld [vmem:[#allocation12 + $0x118] sm:$0xff]  ;;  %v147_v47 = vld [vmem:[#allocation12 + $0xc0] sm:$0xff]  ;;  %v786_v49 = vpack.c.bf16 %v153_v40, %v149_v38 }
  0x79   :  { %v162_v45 = vld [vmem:[#allocation12 + $0x138] sm:$0xff]  ;;  %749 = vmatprep.subr.bf16.mxu0 %v748_v35  ;;  %v752_v46 = vpack.c.bf16 %v152_v42, %v148_v41  ;;  %v151_v48 = vld [vmem:[#allocation12 + $0xe0] sm:$0xff]  ;;  %v156_v50 = vld [vmem:[#allocation12 + $0x108] sm:$0xff] }
  0x7a   :  { %v160_v51 = vld [vmem:[#allocation12 + $0x128] sm:$0xff]  ;;  %v788_v52 = vpack.c.bf16 %v162_v45, %v158_v44  ;;  %v157_v53 = vld [vmem:[#allocation12 + $0x110] sm:$0xff]  ;;  %v754_v55 = vpack.c.bf16 %v151_v48, %v147_v47  ;;  %v166_v56 = vld [vmem:[#allocation12 + $0x158] sm:$0xff] }
  0x7b   :  { %783 = vmatpush1.bf16.msra.mxu1 %v782_v34  ;;  %v161_v54 = vld [vmem:[#allocation12 + $0x130] sm:$0xff]  ;;  %v170_v57 = vld [vmem:[#allocation12 + $0x178] sm:$0xff]  ;;  %v756_v58 = vpack.c.bf16 %v160_v51, %v156_v50  ;;  %v155_v59 = vld [vmem:[#allocation12 + $0x100] sm:$0xff] }
  0x7c   :  { %785 = vmatprep.subr.bf16.mxu1 %v784_v39  ;;  %751 = vmatpush1.bf16.msra.mxu0 %v750_v43  ;;  %v159_v60 = vld [vmem:[#allocation12 + $0x120] sm:$0xff]  ;;  %v790_v61 = vpack.c.bf16 %v161_v54, %v157_v53  ;;  %v164_v62 = vld [vmem:[#allocation12 + $0x148] sm:$0xff]  ;;  %v792_v1 = vpack.c.bf16 %v170_v57, %v166_v56  ;;  %v165_v2 = vld [vmem:[#allocation12 + $0x150] sm:$0xff]  ;;  %v1089_v43 = vmov 0.0|0.0  }
  0x7d   :  { %753 = vmatprep.subr.bf16.mxu0 %v752_v46  ;;  %v168_v63 = vld [vmem:[#allocation12 + $0x168] sm:$0xff]  ;;  %v169_v3 = vld [vmem:[#allocation12 + $0x170] sm:$0xff]  ;;  %v758_v4 = vpack.c.bf16 %v159_v60, %v155_v59  ;;  %v174_v5 = vld [vmem:[#allocation12 + $0x198] sm:$0xff] }
  0x7e   :  { %v178_v6 = vld [vmem:[#allocation12 + $0x1b8] sm:$0xff]  ;;  %v760_v7 = vpack.c.bf16 %v168_v63, %v164_v62  ;;  %v163_v8 = vld [vmem:[#allocation12 + $0x140] sm:$0xff]  ;;  %v794_v10 = vpack.c.bf16 %v169_v3, %v165_v2  ;;  %v172_v11 = vld [vmem:[#allocation12 + $0x188] sm:$0xff]  ;;  %v477_v2 = vlaneseq }
  0x7f   :  { %787 = vmatpush1.bf16.msra.mxu1 %v786_v49  ;;  %v167_v9 = vld [vmem:[#allocation12 + $0x160] sm:$0xff]  ;;  %v176_v12 = vld [vmem:[#allocation12 + $0x1a8] sm:$0xff]  ;;  %v796_v13 = vpack.c.bf16 %v178_v6, %v174_v5  ;;  %v173_v14 = vld [vmem:[#allocation12 + $0x190] sm:$0xff] }
  0x80   :  { %789 = vmatprep.subr.bf16.mxu1 %v788_v52  ;;  %755 = vmatpush1.bf16.msra.mxu0 %v754_v55  ;;  %v177_v15 = vld [vmem:[#allocation12 + $0x1b0] sm:$0xff]  ;;  %v762_v16 = vpack.c.bf16 %v167_v9, %v163_v8  ;;  %v182_v17 = vld [vmem:[#allocation12 + $0x1d8] sm:$0xff]  ;;  %v764_v19 = vpack.c.bf16 %v176_v12, %v172_v11  ;;  %v171_v20 = vld [vmem:[#allocation12 + $0x180] sm:$0xff]  ;;  %v478_v3 = vshrl.u32 %v477_v2, 7 }
  0x81   :  { %757 = vmatprep.subr.bf16.mxu0 %v756_v58  ;;  %v186_v18 = vld [vmem:[#allocation12 + $0x1f8] sm:$0xff]  ;;  %v175_v21 = vld [vmem:[#allocation12 + $0x1a0] sm:$0xff]  ;;  %v798_v22 = vpack.c.bf16 %v177_v15, %v173_v14  ;;  %v180_v23 = vld [vmem:[#allocation12 + $0x1c8] sm:$0xff] }
  0x82   :  { %v184_v24 = vld [vmem:[#allocation12 + $0x1e8] sm:$0xff]  ;;  %v800_v25 = vpack.c.bf16 %v186_v18, %v182_v17  ;;  %v181_v26 = vld [vmem:[#allocation12 + $0x1d0] sm:$0xff]  ;;  %v766_v28 = vpack.c.bf16 %v175_v21, %v171_v20  ;;  %v179_v30 = vld [vmem:[#allocation12 + $0x1c0] sm:$0xff]  ;;  %v483_v5 = vsub.s32 1, %v478_v3  ;;  %v491_v14 = vsub.s32 3, %v478_v3 }
  0x83   :  { %791 = vmatpush1.bf16.msra.mxu1 %v790_v61  ;;  %v185_v27 = vld [vmem:[#allocation12 + $0x1f0] sm:$0xff]  ;;  %v768_v29 = vpack.c.bf16 %v184_v24, %v180_v23  ;;  %v183_v31 = vld [vmem:[#allocation12 + $0x1e0] sm:$0xff]  ;;  %v120_v33 = vld [vmem:[#allocation10 + $0x8] sm:$0xff] }
  0x84   :  { %793 = vmatprep.subr.bf16.mxu1 %v792_v1  ;;  %759 = vmatpush1.bf16.msra.mxu0 %v758_v4  ;;  %v802_v32 = vpack.c.bf16 %v185_v27, %v181_v26  ;;  %v770_v34 = vpack.c.bf16 %v183_v31, %v179_v30  ;;  %v112_v35 = vld [vmem:[#allocation7] sm:$0xff]  ;;  %v119_v36 = vld [vmem:[#allocation10] sm:$0xff]  ;;  %v122_v37 = vld [vmem:[#allocation10 + $0x18] sm:$0xff]  ;;  %v479_v4 = vsub.s32 0, %v478_v3 }
  0x85   :  { %761 = vmatprep.subr.bf16.mxu0 %v760_v7  ;;  %v116_v38 = vld [vmem:[#allocation4] sm:$0xff]  ;;  %v121_v39 = vld [vmem:[#allocation10 + $0x10] sm:$0xff]  ;;  %v528_v40 = vld [vmem:[#allocation13] sm:$0xff] }
  0x86   :  { %v529_v41 = vld [vmem:[#allocation13 + $0x8] sm:$0xff]  ;;  %v530_v44 = vld [vmem:[#allocation13 + $0x10] sm:$0xff]  ;;  %v531_v45 = vld [vmem:[#allocation13 + $0x18] sm:$0xff] }
  0x87   :  { %795 = vmatpush1.bf16.msra.mxu1 %v794_v10  ;;  %v805_v42 = vpack.c.bf16 %v529_v41, %v528_v40  ;;  %v808_v46 = vpack.c.bf16 %v531_v45, %v530_v44  ;;  %v532_v47 = vld [vmem:[#allocation13 + $0x20] sm:$0xff]  ;;  %v533_v48 = vld [vmem:[#allocation13 + $0x28] sm:$0xff]  ;;  %v534_v50 = vld [vmem:[#allocation13 + $0x30] sm:$0xff] }
  0x88   :  { %797 = vmatprep.subr.bf16.mxu1 %v796_v13  ;;  %763 = vmatpush1.bf16.msra.mxu0 %v762_v16  ;;  %v811_v49 = vpack.c.bf16 %v533_v48, %v532_v47  ;;  %v535_v51 = vld [vmem:[#allocation13 + $0x38] sm:$0xff]  ;;  %v536_v53 = vld [vmem:[#allocation13 + $0x40] sm:$0xff]  ;;  %v537_v54 = vld [vmem:[#allocation13 + $0x48] sm:$0xff] }
  0x89   :  { %765 = vmatprep.subr.bf16.mxu0 %v764_v19  ;;  %v814_v52 = vpack.c.bf16 %v535_v51, %v534_v50  ;;  %v817_v55 = vpack.c.bf16 %v537_v54, %v536_v53  ;;  %v538_v56 = vld [vmem:[#allocation13 + $0x50] sm:$0xff]  ;;  %v539_v57 = vld [vmem:[#allocation13 + $0x58] sm:$0xff]  ;;  %v540_v59 = vld [vmem:[#allocation13 + $0x60] sm:$0xff] }
  0x8a   :  { %v820_v58 = vpack.c.bf16 %v539_v57, %v538_v56  ;;  %v541_v60 = vld [vmem:[#allocation13 + $0x68] sm:$0xff]  ;;  %v542_v62 = vld [vmem:[#allocation13 + $0x70] sm:$0xff]  ;;  %v543_v63 = vld [vmem:[#allocation13 + $0x78] sm:$0xff] }
  0x8b   :  { %799 = vmatpush1.bf16.msra.mxu1 %v798_v22  ;;  %v823_v61 = vpack.c.bf16 %v541_v60, %v540_v59  ;;  %v826_v1 = vpack.c.bf16 %v543_v63, %v542_v62  ;;  %v487_v22 = vsub.s32 2, %v478_v3  ;;  %v687_v44 = vld [vmem:[%s1275_s7] ss:$0 sm:$0xff] }
  0x8c   :  { %801 = vmatprep.subr.bf16.mxu1 %v800_v25  ;;  %767 = vmatpush1.bf16.msra.mxu0 %v766_v28 }
  0x8d   :  { %769 = vmatprep.subr.bf16.mxu0 %v768_v29 }
  0x8f   :  { %803 = vmatpush1.bf16.msra.mxu1 %v802_v32 }
  0x90   :  { %333 = vmatprep.subr.mxu1 %v120_v33  ;;  %771 = vmatpush1.bf16.msra.mxu0 %v770_v34  ;;  %v114_v33 = vld [vmem:[#allocation9] sm:$0xff] }
  0x91   :  { %804 = vmatprep.subr.bf16.mxu0 %v1089_v43 }
  0x92   :  { %323 = vmatmul.mubr.f32.vlgmr.msra.gmra.mrb[0].mxu1 %v112_v35 }
  0x93   :  { %334 = vmatpush1.msra.mxu1 %v119_v36  ;;  %397 = vmatprep.mubr.f32.mxu1 %v1088_v0 }
  0x94   :  { %252 = vmatmul.mubr.f32.vlgmr.msra.gmra.mrb[0].mxu0 %v112_v35  ;;  %404 = vmatprep.subr.mxu1 %v122_v37 }
  0x95   :  { %806 = vmatpush3.bf16.msra.mxu0 %v805_v42  ;;  %737 = vmatprep.mubr.msk.f32.mxu0 %vm1090_vm1, %v1088_v0 }
  0x96   :  { %682 = vmatmul.mubr.msk.f32.vlgmr.msra.gmra.mrb[2].mxu1 %vm329_vm0, %v116_v38  ;;  %807 = vmatprep.subr.bf16.mxu0 %v1089_v43 }
  0x97   :  { %405 = vmatpush1.msra.mxu1 %v121_v39  ;;  %468 = vmatprep.mubr.f32.mxu1 %v1088_v0  ;;  %v475_v0 = vld [vmem:[%s1273_s5] sm:$0xf] }
  0x98   :  { %v480_v7 = vrot.slane %v475_v0, %v479_v4  ;;  %v484_v10 = vrot.slane %v475_v0, %v483_v5  ;;  %v492_v21 = vrot.slane %v475_v0, %v491_v14  ;;  %v488_v24 = vrot.slane %v475_v0, %v487_v22 }
  0x99   :  { %809 = vmatpush3.bf16.msra.mxu0 %v808_v46 }
  0x9a   :  { %683 = vmatmul.mubr.msk.f32.vlgmr.msra.gmra.mrb[0].mxu1 %vm329_vm0, %v116_v38  ;;  %810 = vmatprep.subr.bf16.mxu0 %v1089_v43 }
  0x9d   :  { %812 = vmatpush3.bf16.msra.mxu0 %v811_v49 }
  0x9e   :  { %813 = vmatprep.subr.bf16.mxu0 %v1089_v43 }
  0xa1   :  { %815 = vmatpush3.bf16.msra.mxu0 %v814_v52 }
  0xa2   :  { %816 = vmatprep.subr.bf16.mxu0 %v1089_v43 }
  0xa5   :  { %818 = vmatpush3.bf16.msra.mxu0 %v817_v55 }
  0xa6   :  { %819 = vmatprep.subr.bf16.mxu0 %v1089_v43 }
  0xa9   :  { %821 = vmatpush3.bf16.msra.mxu0 %v820_v58 }
  0xaa   :  { %822 = vmatprep.subr.bf16.mxu0 %v1089_v43 }
  0xad   :  { %824 = vmatpush3.bf16.msra.mxu0 %v823_v61 }
  0xae   :  { %825 = vmatprep.subr.bf16.mxu0 %v1089_v43 }
  0xb1   :  { %827 = vmatpush3.bf16.msra.mxu0 %v826_v1 }
 0x167   :  { %v253_v6 = vpop.f32.mrb[0].mxu0 }
 0x168   :  { %v255_v8 = vpop.f32.mrb[1].mxu0 }
 0x169   :  { %v399_v9 = vpop.f32.mrb[2].mxu1 }
 0x16a   :  { %v400_v11 = vadd.f32 %v399_v9, %v253_v6  ;;  %v401_v12 = vpop.f32.mrb[3].mxu1 }
 0x16b   :  { %v402_v13 = vadd.f32 %v401_v12, %v255_v8 }
 0x16c   :  { %v497_v15 = vadd.f32 %v480_v7, %v400_v11 }
 0x16d   :  { %v498_v16 = vadd.f32 %v484_v10, %v402_v13  ;;  %v470_v17 = vpop.f32.mrb[0].mxu1 }
 0x16e   :  { %v684_v18 = vmul.f32 -1.442695, %v497_v15  ;;  %v472_v19 = vpop.f32.mrb[1].mxu1  ;;  %v499_v26 = vadd.f32 %v488_v24, %v470_v17 }
 0x16f   :  { %v685_v20 = vmul.f32 -1.442695, %v498_v16  ;;  %v500_v23 = vadd.f32 %v492_v21, %v472_v19 }
 0x170   :  { %848 = vpow2.f32 %v684_v18 }
 0x171   :  { %850 = vpow2.f32 %v685_v20  ;;  %v686_v25 = vmul.f32 -1.442695, %v500_v23 }
 0x173   :  { %852 = vpow2.f32 %v686_v25 }
 0x174   :  { %854 = vtanh.f32 %v499_v26 }
 0x17a   :  { %v849_v27 = vpop.eup %848 }
 0x17b   :  { %v851_v28 = vpop.eup %850  ;;  %v504_v29 = vadd.f32 1.0, %v849_v27 }
 0x17c   :  { %v510_v30 = vadd.f32 1.0, %v851_v28 }
 0x17d   :  { %856 = vrcp.f32 %v504_v29  ;;  %v853_v31 = vpop.eup %852 }
 0x17e   :  { %858 = vrcp.f32 %v510_v30  ;;  %v855_v32 = vpop.eup %854  ;;  %v517_v37 = vadd.f32 1.0, %v853_v31 }
 0x180   :  { %860 = vrcp.f32 %v517_v37 }
 0x187   :  { %v857_v34 = vpop.eup %856 }
 0x188   :  { %v859_v35 = vpop.eup %858  ;;  %v521_v36 = vmul.f32 %v857_v34, %v855_v32 }
 0x189   :  { %v520_v38 = vmul.f32 %v859_v35, %v114_v33 }
 0x18a   :  { %v861_v40 = vpop.eup %860 }
 0x18b   :  { %v522_v39 = vadd.f32 %v521_v36, %v520_v38 }
 0x18d   :  { %862 = vtanh.f32 %v522_v39  ;;  %636 = vst [vmem:[#allocation18] sm:$0xff] %v522_v39 }
 0x197   :  { %v863_v41 = vpop.eup %862 }
 0x198   :  { %v524_v42 = vmul.f32 %v863_v41, %v861_v40 }
 0x19a   :  { %v527_v43 = vmax.f32 %v524_v42, 0.0  ;;  %635 = vst [vmem:[#allocation16] sm:$0xff] %v524_v42 }
 0x19c   :  { %738 = vmatmul.mubr.f32.vlgmr.msra.gmra.mrb[2].mxu0 %v527_v43 }
 0x26f   :  { %v617_v45 = vpop.f32.mrb[2].mxu0 }
 0x270   :  { %v618_v46 = vadd.f32 %v687_v44, %v617_v45  ;;  %v739_v47 = vpop.f32.mrb[3].mxu0 }
 0x272   :  { %621 = vmax.xlane.f32.xlu0 %v618_v46 }
 0x2ff   :  { %v622_v48 = vpop.xlane.xlu0 %621 }
 0x300   :  { %v623_v49 = vsub.f32 %v618_v46, %v622_v48 }
 0x302   :  { %v624_v50 = vmul.f32 1.442695, %v623_v49 }
 0x304   :  { %864 = vpow2.f32 %v624_v50 }
 0x30e   :  { %v865_v51 = vpop.eup %864 }
 0x30f   :  { %626 = vadd.xlane.f32.xlu0 %v865_v51 }
 0x310   :  { %1011 = shalt.err (!%p1008_p10)
}
 0x311   :  { %s1012_s3 = scalar_lea.hbm %s1277_s9, 128 }
 0x312   :  { %p1013_p11 = scmp.ne.s32.totalorder %s1277_s9, %s1012_s3  ;;  %p1016_p12 = scmp.lt.u32.totalorder %s1012_s3, %s1277_s9 }
 0x314   :  { %p1018_p13 = pnand %p1016_p12, %p1013_p11 }
 0x316   :  { %1021 = shalt.err (!%p1018_p13)
}
 0x317   :  { %656 = dma.vmem_to_hbm [thread:$0]  %s654_s25, 128, %s1277_s9, [#allocation17]  }
 0x318   :  { %s1092_s11 = smov [#allocation18]  }
 0x319   :  { %s663_s12 = sshll.u32 %s1092_s11, 4  ;;  %s664_s12 = int_to_ptr.vmem [resolvable:$true] %s663_s12 }
 0x31a   :  { %s1022_s13 = scalar_lea.vmem %s664_s12, 128  ;;  %p1027_p1 = scmp.lt.s32.totalorder %s664_s12, %s664_s12 }
 0x31b   :  { %p1023_p0 = scmp.ne.s32.totalorder %s664_s12, %s1022_s13  ;;  %p1028_p2 = scmp.lt.s32.totalorder %s1022_s13, %s1022_s13 }
 0x31d   :  { %p1029_p3 = por %p1028_p2, %p1027_p1 }
 0x31f   :  { %p1030_p4 = pnand %p1029_p3, %p1023_p0 }
 0x321   :  { %1033 = shalt.err (!%p1030_p4)
}
 0x322   :  { %s1034_s14 = scalar_lea.hbm %s1278_s10, 128 }
 0x323   :  { %p1035_p5 = scmp.ne.s32.totalorder %s1278_s10, %s1034_s14  ;;  %p1038_p6 = scmp.lt.u32.totalorder %s1034_s14, %s1278_s10 }
 0x325   :  { %p1040_p7 = pnand %p1038_p6, %p1035_p5 }
 0x327   :  { %1043 = shalt.err (!%p1040_p7)
}
 0x328   :  { %666 = dma.vmem_to_hbm [thread:$0]  %s664_s12, 128, %s1278_s10, [#allocation17]  }
 0x329   :  { %s1093_s21 = smov [#allocation15]  }
 0x32a   :  { %s643_s6 = sshll.u32 %s1093_s21, 4  ;;  %s644_s6 = int_to_ptr.vmem [resolvable:$true] %s643_s6 }
 0x32b   :  { %s1044_s22 = scalar_lea.vmem %s644_s6, 128  ;;  %p1049_p9 = scmp.lt.s32.totalorder %s644_s6, %s644_s6 }
 0x32c   :  { %p1045_p8 = scmp.ne.s32.totalorder %s644_s6, %s1044_s22  ;;  %p1050_p10 = scmp.lt.s32.totalorder %s1044_s22, %s1044_s22 }
 0x32e   :  { %p1051_p11 = por %p1050_p10, %p1049_p9 }
 0x330   :  { %p1052_p12 = pnand %p1051_p11, %p1045_p8 }
 0x39c   :  { %v627_v52 = vpop.xlane.xlu0 %626 }
 0x39d   :  { %866 = vlog2.f32 %v627_v52 }
 0x3a7   :  { %v867_v53 = vpop.eup %866 }
 0x3a8   :  { %v629_v54 = vmul.f32 0.6931472, %v867_v53 }
 0x3aa   :  { %v630_v55 = vsub.f32 %v623_v49, %v629_v54 }
 0x3ac   :  { %631 = vst [vmem:[#allocation15] sm:$0xff] %v630_v55 }
 0x3ad   :  { %1055 = shalt.err (!%p1052_p12)
}
 0x3ae   :  { %s1056_s10 = scalar_lea.hbm %s1276_s8, 128 }
 0x3af   :  { %p1057_p13 = scmp.ne.s32.totalorder %s1276_s8, %s1056_s10  ;;  %p1060_p0 = scmp.lt.u32.totalorder %s1056_s10, %s1276_s8 }
 0x3b1   :  { %p1062_p1 = pnand %p1060_p0, %p1057_p13 }
 0x3b3   :  { %1065 = shalt.err (!%p1062_p1)
}
 0x3b4   :  { %646 = dma.vmem_to_hbm [thread:$0]  %s644_s6, 128, %s1276_s8, [#allocation6]  }
 0x3b5   :  { %1074 = dma.done.wait [#allocation6], 128  }
 0x3b6   :  { %1075 = vsyncadd [#allocation6], 4294967168 }
 0x3b7   :  { %1076 = dma.done.wait [#allocation17], 256  }
 0x3b8   :  { %1077 = vsyncadd [#allocation17], 4294967040 }
 0x3b9   :  { %676 = vsyncpa [#allocation5], 1 }
 0x3ba   :  { %677 = vsyncpa [#allocation8], 1 }
 0x3bb   :  { %678 = vsyncpa [#allocation11], 1 }
 0x3bc   :  { %679 = vsyncpa [#allocation14], 1 }
 0x3bd   :  { %680 = vsyncpa [#allocation6], 1 }
 0x3be   :  { %681 = vsyncpa [#allocation17], 1 }

</bundles_post_ra>
